<compile_context>
chip_gen: v6e
topology: v6e:2x2x1
jax: 0.10.0
libtpu: 0.0.40
codegen_flags: <defaults>
</compile_context>

<pallas_src>
import functools

import jax
import jax.numpy as jnp
from jax import lax
from jax.experimental import pallas as pl
from jax.experimental.pallas import tpu as pltpu

EPS = 1e-5
LANE = 128


def _round_up(n, m):
    return ((n + m - 1) // m) * m


def _pad2d(a, rows, cols):
    return jnp.pad(a, ((0, rows - a.shape[0]), (0, cols - a.shape[1])))


def _usable_vmem_bytes():
    """Generation-aware VMEM budget (physical capacity minus headroom)."""
    try:
        cap = int(pltpu.get_tpu_info().vmem_capacity_bytes)
    except Exception:  # non-TPU interpreters / older APIs
        cap = 64 << 20                      # conservative (v7x-sized) fallback
    return (cap * 3) // 4                   # headroom for compiler scratch


def _vmem_limit(bytes_needed):
    return int(min(max(bytes_needed + (4 << 20), 8 << 20), _usable_vmem_bytes()))


def _pick_tile_rows(n, max_width, weight_bytes):
    """Largest row tile (multiple of 8, <= 512) whose double-buffered bf16
    input+output tiles fit the VMEM budget left after the weights."""
    budget = max(_usable_vmem_bytes() - weight_bytes - (8 << 20), 4 << 20)
    tn = min(512, _round_up(max(n, 1), 8))
    while tn > 8 and 8 * tn * max_width > budget:   # 2 tiles x 2 bufs x bf16
        tn = max(8, _round_up(tn // 2, 8))
    return tn


# ----------------------------- kernels --------------------------------------

def _lin_stats_kernel(x_ref, w_ref, h_ref, st_ref):
    """h = x @ w (bf16 MXU, f32 acc); emit per-tile (sum, sumsq) of h.

    No bias: the following BatchNorm's mean subtraction cancels it exactly.
    Zero-padded batch rows / feature lanes contribute exact zeros to stats.
    """
    h = jnp.dot(x_ref[...], w_ref[...], preferred_element_type=jnp.float32)
    h_ref[...] = h.astype(h_ref.dtype)
    ssum = jnp.sum(h, axis=0, keepdims=True)
    ssq = jnp.sum(h * h, axis=0, keepdims=True)
    st_ref[...] = jnp.concatenate([ssum, ssq], axis=0)[None]


def _bn_relu_lin_stats_kernel(h_in_ref, st_in_ref, w_ref, h_ref, st_ref, *,
                              tile_rows, n_true, mask_rows):
    """a = relu(h_in * s + t);  h = a @ w;  emit per-tile (sum, sumsq) of h."""
    s = st_in_ref[0:1, :]                              # (1, Pin) f32 scale
    t = st_in_ref[1:2, :]                              # (1, Pin) f32 shift
    a = jnp.maximum(h_in_ref[...].astype(jnp.float32) * s + t, 0.0)
    if mask_rows:
        # Padded batch rows would become relu(t) != 0; zero them so they do
        # not pollute this layer's statistics (or the stored activations).
        row = (pl.program_id(0) * tile_rows
               + lax.broadcasted_iota(jnp.int32, (tile_rows, 1), 0))
        a = jnp.where(row < n_true, a, 0.0)
    h = jnp.dot(a.astype(w_ref.dtype), w_ref[...],
                preferred_element_type=jnp.float32)
    h_ref[...] = h.astype(h_ref.dtype)
    ssum = jnp.sum(h, axis=0, keepdims=True)
    ssq = jnp.sum(h * h, axis=0, keepdims=True)
    st_ref[...] = jnp.concatenate([ssum, ssq], axis=0)[None]


def _bn_relu_lin_out_kernel(h_in_ref, st_in_ref, w_ref, b_ref, o_ref):
    """out = relu(h_in * s + t) @ w + b  (final layer, lane-dense store)."""
    s = st_in_ref[0:1, :]
    t = st_in_ref[1:2, :]
    a = jnp.maximum(h_in_ref[...].astype(jnp.float32) * s + t, 0.0)
    o_ref[...] = (jnp.dot(a.astype(w_ref.dtype), w_ref[...],
                          preferred_element_type=jnp.float32) + b_ref[...])


# ----------------------------- wrapper ---------------------------------------

def _fold_bn(stats_part, gamma_row, beta_row, n):
    """Reduce per-tile (sum, sumsq) partials and fold BN into (scale, shift):
       s = gamma * rsqrt(var + eps),  t = beta - mu * s,  bn(h) = h*s + t."""
    stats = jnp.sum(stats_part, axis=0)                  # (2, P) f32
    mu = stats[0:1] / n
    var = jnp.maximum(stats[1:2] / n - mu * mu, 0.0)     # biased variance
    s = gamma_row * lax.rsqrt(var + EPS)
    t = beta_row - mu * s
    return jnp.concatenate([s, t], axis=0)               # (2, P) f32


def encoder_forward(x, params):
    """x: (N, D_in) float32.  params: dict of unpadded, pre-transposed weights.

    params layout:
      w1:(D_in,H2) b1:(H2,) g1:(H2,) be1:(H2,)
      w2:(H2,H1)   b2:(H1,) g2:(H1,) be2:(H1,)
      w3:(H1,D_out) b3:(D_out,)
    b1/b2 are accepted but unused: they cancel exactly under batch-stat BN.
    """
    N, D_in = x.shape
    H2 = params["w1"].shape[1]
    H1 = params["w2"].shape[1]
    D_out = params["w3"].shape[1]

    Pd, P2, P1, Po = (_round_up(d, LANE) for d in (D_in, H2, H1, D_out))

    wbytes = 2 * 2 * max(Pd * P2, P2 * P1, P1 * Po)      # bf16, double-buffered
    TN = _pick_tile_rows(N, max(Pd, P2, P1, Po), wbytes)
    n_pad = _round_up(N, TN)
    ntiles = n_pad // TN

    # --- lane/row padding (layout plumbing; padded lanes/rows stay zero) ---
    xp = _pad2d(x.astype(jnp.float32), n_pad, Pd).astype(jnp.bfloat16)
    w1p = _pad2d(params["w1"], Pd, P2).astype(jnp.bfloat16)
    w2p = _pad2d(params["w2"], P2, P1).astype(jnp.bfloat16)
    w3p = _pad2d(params["w3"], P1, Po).astype(jnp.bfloat16)

    def row(a, width):
        return _pad2d(a.reshape(1, -1).astype(jnp.float32), 1, width)

    g1p, be1p = row(params["g1"], P2), row(params["be1"], P2)
    g2p, be2p = row(params["g2"], P1), row(params["be2"], P1)
    b3p = row(params["b3"], Po)

    # --- per-call VMEM footprints (double-buffered tiles + resident weights) ---
    f16, f32 = 2, 4
    need1 = 2 * (TN * Pd * f16 + TN * P2 * f16 + 2 * P2 * f32) + 2 * Pd * P2 * f16
    need2 = (2 * (TN * P2 * f16 + TN * P1 * f16 + 2 * P1 * f32)
             + 2 * (P2 * P1 * f16 + 2 * P2 * f32))
    need3 = (2 * (TN * P1 * f16 + TN * Po * f32)
             + 2 * (P1 * Po * f16 + 2 * P1 * f32 + Po * f32))

    def cparams(need):
        return pltpu.CompilerParams(dimension_semantics=("parallel",),
                                    vmem_limit_bytes=_vmem_limit(need))

    # ---- layer 1: x @ w1  (+ per-tile batch-stat partials) ----
    h1, sp1 = pl.pallas_call(
        _lin_stats_kernel,
        out_shape=(jax.ShapeDtypeStruct((n_pad, P2), jnp.bfloat16),
                   jax.ShapeDtypeStruct((ntiles, 2, P2), jnp.float32)),
        grid=(ntiles,),
        in_specs=[pl.BlockSpec((TN, Pd), lambda i: (i, 0)),
                  pl.BlockSpec((Pd, P2), lambda i: (0, 0))],
        out_specs=(pl.BlockSpec((TN, P2), lambda i: (i, 0)),
                   pl.BlockSpec((1, 2, P2), lambda i: (i, 0, 0))),
        compiler_params=cparams(need1),
    )(xp, w1p)
    st1 = _fold_bn(sp1, g1p, be1p, N)

    # ---- layer 2: bn+relu, @ w2  (+ per-tile batch-stat partials) ----
    k2 = functools.partial(_bn_relu_lin_stats_kernel, tile_rows=TN,
                           n_true=N, mask_rows=(n_pad != N))
    h2, sp2 = pl.pallas_call(
        k2,
        out_shape=(jax.ShapeDtypeStruct((n_pad, P1), jnp.bfloat16),
                   jax.ShapeDtypeStruct((ntiles, 2, P1), jnp.float32)),
        grid=(ntiles,),
        in_specs=[pl.BlockSpec((TN, P2), lambda i: (i, 0)),
                  pl.BlockSpec((2, P2), lambda i: (0, 0)),
                  pl.BlockSpec((P2, P1), lambda i: (0, 0))],
        out_specs=(pl.BlockSpec((TN, P1), lambda i: (i, 0)),
                   pl.BlockSpec((1, 2, P1), lambda i: (i, 0, 0))),
        compiler_params=cparams(need2),
    )(h1, st1, w2p)
    st2 = _fold_bn(sp2, g2p, be2p, N)

    # ---- layer 3: bn+relu, @ w3 + b3  (lane-dense padded store) ----
    outp = pl.pallas_call(
        _bn_relu_lin_out_kernel,
        out_shape=jax.ShapeDtypeStruct((n_pad, Po), jnp.float32),
        grid=(ntiles,),
        in_specs=[pl.BlockSpec((TN, P1), lambda i: (i, 0)),
                  pl.BlockSpec((2, P1), lambda i: (0, 0)),
                  pl.BlockSpec((P1, Po), lambda i: (0, 0)),
                  pl.BlockSpec((1, Po), lambda i: (0, 0))],
        out_specs=pl.BlockSpec((TN, Po), lambda i: (i, 0)),
        compiler_params=cparams(need3),
    )(h2, st2, w3p, b3p)

    return outp[:N, :D_out]


# ----------------------------- reference / init ------------------------------

def _reference_forward(x, p):
    """Plain-JAX f32 reference (includes b1/b2, so it also checks that the
    in-kernel bias elimination is exact under batch-stat BN)."""
    def bn(h, g, be):
        mu = jnp.mean(h, axis=0, keepdims=True)
        var = jnp.mean((h - mu) ** 2, axis=0, keepdims=True)   # biased var
        return (h - mu) / jnp.sqrt(var + EPS) * g + be
    h = jnp.maximum(bn(x @ p["w1"] + p["b1"], p["g1"], p["be1"]), 0.0)
    h = jnp.maximum(bn(h @ p["w2"] + p["b2"], p["g2"], p["be2"]), 0.0)
    return h @ p["w3"] + p["b3"]


def init_params(key, D_in, H2, H1, D_out):
    ks = jax.random.split(key, 9)

    def lin(kw, kb, fin, fout):
        # torch Linear init: U(-1/sqrt(fin), 1/sqrt(fin)); stored (fout, fin)
        bound = 1.0 / jnp.sqrt(fin)
        w = jax.random.uniform(kw, (fout, fin), jnp.float32, -bound, bound)
        b = jax.random.uniform(kb, (fout,), jnp.float32, -bound, bound)
        return w.T, b                                     # pre-transpose for x @ W

    w1, b1 = lin(ks[0], ks[1], D_in, H2)
    w2, b2 = lin(ks[2], ks[3], H2, H1)
    w3, b3 = lin(ks[4], ks[5], H1, D_out)
    # BatchNorm affine params (non-trivial but deterministic)
    g1 = 1.0 + 0.1 * jax.random.normal(ks[6], (H2,), jnp.float32)
    be1 = 0.1 * jax.random.normal(ks[7], (H2,), jnp.float32)
    g2 = 1.0 + 0.1 * jax.random.normal(ks[8], (H1,), jnp.float32)
    be2 = jnp.zeros((H1,), jnp.float32)
    return dict(w1=w1, b1=b1, g1=g1, be1=be1,
                w2=w2, b2=b2, g2=g2, be2=be2,
                w3=w3, b3=b3)


if __name__ == "__main__":
    # Small shapes consistent with the MLP encoder.
    N, D_in, H2, H1, D_out = 8, 32, 24, 16, 8

    key = jax.random.PRNGKey(0)
    kx, kp = jax.random.split(key)
    x = jax.random.normal(kx, (N, D_in), jnp.float32)
    params = init_params(kp, D_in, H2, H1, D_out)

    out = jax.block_until_ready(encoder_forward(x, params))
    ref = _reference_forward(x, params)

    assert out.shape == (N, D_out)
    # bf16 MXU operands -> loosened tolerance vs. the pure-f32 reference.
    assert jnp.allclose(out, ref, atol=5e-2, rtol=5e-2), (
        "mismatch vs reference: max abs diff = "
        f"{float(jnp.max(jnp.abs(out - ref)))}")
    print("KERNEL_OK")
</pallas_src>

<mosaic_0001>
module attributes {stable_mosaic.version = 11 : i64} {
  func.func @_lin_stats_kernel(%arg0: i32, %arg1: memref<8x128xbf16, #tpu.memory_space<vmem>>, %arg2: memref<128x128xbf16, #tpu.memory_space<vmem>>, %arg3: memref<8x128xbf16, #tpu.memory_space<vmem>>, %arg4: memref<1x2x128xf32, #tpu.memory_space<vmem>>) attributes {dimension_semantics = [#tpu.dimension_semantics<parallel>], iteration_bounds = array<i64: 1>, scalar_prefetch = 0 : i64, scratch_operands = 0 : i64, tpu.core_type = #tpu.core_type<tc>, window_params = [{transform_indices = @transform_0, window_bounds = array<i64: 8, 128>}, {pipeline_mode = #tpu.pipeline_mode<synchronous>, transform_indices = @transform_1, window_bounds = array<i64: 128, 128>}, {transform_indices = @transform_2, window_bounds = array<i64: 8, 128>}, {transform_indices = @transform_3, window_bounds = array<i64: 1, 2, 128>}]} {
    %c0 = arith.constant 0 : index
    %c0_0 = arith.constant 0 : index
    %0 = vector.load %arg1[%c0, %c0_0] : memref<8x128xbf16, #tpu.memory_space<vmem>>, vector<8x128xbf16>
    %c0_1 = arith.constant 0 : index
    %c0_2 = arith.constant 0 : index
    %1 = vector.load %arg2[%c0_1, %c0_2] : memref<128x128xbf16, #tpu.memory_space<vmem>>, vector<128x128xbf16>
    %cst = arith.constant dense<0.000000e+00> : vector<8x128xf32>
    %2 = tpu.matmul %0, %1, %cst {dimension_numbers = #tpu.dot_dimension_numbers<[1], [0], [0], [1], [0, 0, 1, 1], [], []>} : vector<8x128xbf16>, vector<128x128xbf16>, vector<8x128xf32> -> vector<8x128xf32>
    %3 = arith.truncf %2 : vector<8x128xf32> to vector<8x128xbf16>
    %c0_3 = arith.constant 0 : index
    %c0_4 = arith.constant 0 : index
    %4 = vector.load %arg3[%c0_3, %c0_4] : memref<8x128xbf16, #tpu.memory_space<vmem>>, vector<8x128xbf16>
    tpu.vector_store %arg3[%c0_3, %c0_4], %3 {strides = array<i32>} : memref<8x128xbf16, #tpu.memory_space<vmem>>, vector<8x128xbf16>,
    %cst_5 = arith.constant dense<0.000000e+00> : vector<128xf32>
    %5 = vector.multi_reduction <add>, %2, %cst_5 [0] : vector<8x128xf32> to vector<128xf32>
    %6 = vector.shape_cast %5 : vector<128xf32> to vector<1x128xf32>
    %7 = arith.mulf %2, %2 : vector<8x128xf32>
    %cst_6 = arith.constant dense<0.000000e+00> : vector<128xf32>
    %8 = vector.multi_reduction <add>, %7, %cst_6 [0] : vector<8x128xf32> to vector<128xf32>
    %9 = vector.shape_cast %8 : vector<128xf32> to vector<1x128xf32>
    %10 = tpu.concatenate %6, %9 in 0 : vector<1x128xf32>, vector<1x128xf32> -> vector<2x128xf32>
    %11 = vector.shape_cast %10 : vector<2x128xf32> to vector<1x2x128xf32>
    %c0_7 = arith.constant 0 : index
    %c0_8 = arith.constant 0 : index
    %c0_9 = arith.constant 0 : index
    %12 = vector.load %arg4[%c0_7, %c0_8, %c0_9] : memref<1x2x128xf32, #tpu.memory_space<vmem>>, vector<1x2x128xf32>
    tpu.vector_store %arg4[%c0_7, %c0_8, %c0_9], %11 {strides = array<i32>} : memref<1x2x128xf32, #tpu.memory_space<vmem>>, vector<1x2x128xf32>,
    return
  }
  func.func @transform_0(%arg0: i32) -> (i32, i32) {
    %c0_i32 = arith.constant 0 : i32
    %c0_i32_0 = arith.constant 0 : i32
    return %arg0, %c0_i32 : i32, i32
  }
  func.func @transform_1(%arg0: i32) -> (i32, i32) {
    %c0_i32 = arith.constant 0 : i32
    %c0_i32_0 = arith.constant 0 : i32
    %c0_i32_1 = arith.constant 0 : i32
    return %c0_i32, %c0_i32_0 : i32, i32
  }
  func.func @transform_2(%arg0: i32) -> (i32, i32) {
    %c0_i32 = arith.constant 0 : i32
    %c0_i32_0 = arith.constant 0 : i32
    return %arg0, %c0_i32 : i32, i32
  }
  func.func @transform_3(%arg0: i32) -> (i32, i32, i32) {
    %c0_i32 = arith.constant 0 : i32
    %c0_i32_0 = arith.constant 0 : i32
    %c0_i32_1 = arith.constant 0 : i32
    return %arg0, %c0_i32, %c0_i32_0 : i32, i32, i32
  }
}

</mosaic_0001>

<bundles_post_ra>
// kernel: tpu_custom_call.1
= control target key start
LH: loop header
LB: loop body
LE: loop exit
PB: predicated region body
PF: predicated region fallthrough
CT: control target
= control target key end

     0   :  { %9 = vsyncpa [#allocation3], 0  ;;  %s376_s0 = inlined_call_operand.hbm [shape: bf16[8,128], index: 0, kind: input, shape index: {}]   ;;  %s377_s1 = inlined_call_operand.hbm [shape: bf16[128,128], index: 1, kind: input, shape index: {}]   ;;  %s378_s2 = inlined_call_operand.hbm [shape: bf16[8,128], index: 2, kind: output, shape index: {0}]   ;;  %s379_s3 = inlined_call_operand.hbm [shape: f32[1,2,128], index: 3, kind: output, shape index: {1}]  }
   0x1   :  { %10 = vsyncpa [#allocation6], 0 }
   0x2   :  { %11 = vsyncpa [#allocation4], 0 }
   0x3   :  { %12 = vsyncpa [#allocation9], 0  ;;  %s336_s12 = smov [#allocation2]   ;;  %s337_s14 = smov [#allocation5]  }
   0x4   :  { %s19_s13 = sshll.u32 %s336_s12, 4  ;;  %s28_s15 = sshll.u32 %s337_s14, 4  ;;  %s20_s13 = int_to_ptr.vmem [resolvable:$true] %s19_s13  ;;  %s29_s15 = int_to_ptr.vmem [resolvable:$true] %s28_s15 }
   0x5   :  { %s256_s16 = scalar_lea.vmem %s20_s13, 64  ;;  %p261_p1 = scmp.lt.s32.totalorder %s20_s13, %s20_s13 }
   0x6   :  { %p257_p0 = scmp.ne.s32.totalorder %s20_s13, %s256_s16  ;;  %p262_p2 = scmp.lt.s32.totalorder %s256_s16, %s256_s16 }
   0x8   :  { %p263_p3 = por %p262_p2, %p261_p1 }
   0xa   :  { %p264_p4 = pnand %p263_p3, %p257_p0 }
   0xc   :  { %267 = shalt.err (!%p264_p4)
}
   0xd   :  { %22 = dma.hbm_to_vmem [thread:$0]  %s376_s0, 64, %s20_s13, [#allocation3]  }
   0xe   :  { %s276_s19 = scalar_lea.vmem %s29_s15, 1024  ;;  %p281_p6 = scmp.lt.s32.totalorder %s29_s15, %s29_s15 }
   0xf   :  { %p277_p5 = scmp.ne.s32.totalorder %s29_s15, %s276_s19  ;;  %p282_p7 = scmp.lt.s32.totalorder %s276_s19, %s276_s19 }
  0x11   :  { %p283_p8 = por %p282_p7, %p281_p6 }
  0x13   :  { %p284_p9 = pnand %p283_p8, %p277_p5 }
  0x15   :  { %287 = shalt.err (!%p284_p9)
}
  0x16   :  { %s338_s20 = smov 64   ;;  %s339_s21 = smov 4  }
  0x17   :  { %34 = dma.hbm_to_vmem [thread:$0]  %s377_s1, 1024, %s29_s15, [#allocation6], %s338_s20, %s338_s20, %s339_s21  }
  0x18   :  { %328 = dma.done.wait [#allocation3], 64  }
  0x19   :  { %329 = vsyncadd [#allocation3], 4294967232 }
  0x1a   :  { %330 = dma.done.wait [#allocation6], 1024  }
  0x1b   :  { %331 = vsyncadd [#allocation6], 4294966272  ;;  %v340_v0 = vmov 0.0   ;;  %vm341_vm0 = vmmov 0   ;;  %v240_v1 = vld [vmem:[#allocation5 + $0x38] sm:$0xff]   ;;  %v241_v2 = vld [vmem:[#allocation5 + $0x30] sm:$0xff]  }
  0x1c   :  { %212 = vmatprep.subr.bf16.mxu0 %v340_v0  ;;  %228 = vmatprep.mubr.msk.bf16.mxu0 %vm341_vm0, %v340_v0  ;;  %v242_v3 = vld [vmem:[#allocation5 + $0x28] sm:$0xff]   ;;  %v243_v4 = vld [vmem:[#allocation5 + $0x20] sm:$0xff]   ;;  %v244_v5 = vld [vmem:[#allocation5 + $0x18] sm:$0xff]   ;;  %s342_s0 = smov [#allocation7]  }
  0x1d   :  { %213 = vmatpush3.bf16.msra.mxu0 %v240_v1  ;;  %v245_v6 = vld [vmem:[#allocation5 + $0x10] sm:$0xff]   ;;  %v246_v7 = vld [vmem:[#allocation5 + $0x8] sm:$0xff]   ;;  %v247_v8 = vld [vmem:[#allocation5] sm:$0xff]   ;;  %s171_s1 = sshll.u32 %s342_s0, 4  ;;  %s172_s1 = int_to_ptr.vmem [resolvable:$true] %s171_s1 }
  0x1e   :  { %214 = vmatprep.subr.bf16.mxu0 %v340_v0  ;;  %v42_v9 = vld [vmem:[#allocation2] sm:$0xf]  ;;  %s288_s24 = scalar_lea.vmem %s172_s1, 64  ;;  %p293_p11 = scmp.lt.s32.totalorder %s172_s1, %s172_s1 }
  0x1f   :  { %p289_p10 = scmp.ne.s32.totalorder %s172_s1, %s288_s24  ;;  %p294_p12 = scmp.lt.s32.totalorder %s288_s24, %s288_s24 }
  0x21   :  { %215 = vmatpush3.bf16.msra.mxu0 %v241_v2  ;;  %p295_p13 = por %p294_p12, %p293_p11 }
  0x22   :  { %216 = vmatprep.subr.bf16.mxu0 %v340_v0 }
  0x23   :  { %p296_p0 = pnand %p295_p13, %p289_p10 }
  0x25   :  { %217 = vmatpush3.bf16.msra.mxu0 %v242_v3 }
  0x26   :  { %218 = vmatprep.subr.bf16.mxu0 %v340_v0 }
  0x29   :  { %219 = vmatpush3.bf16.msra.mxu0 %v243_v4 }
  0x2a   :  { %220 = vmatprep.subr.bf16.mxu0 %v340_v0 }
  0x2d   :  { %221 = vmatpush3.bf16.msra.mxu0 %v244_v5 }
  0x2e   :  { %222 = vmatprep.subr.bf16.mxu0 %v340_v0 }
  0x31   :  { %223 = vmatpush3.bf16.msra.mxu0 %v245_v6 }
  0x32   :  { %224 = vmatprep.subr.bf16.mxu0 %v340_v0 }
  0x35   :  { %225 = vmatpush3.bf16.msra.mxu0 %v246_v7 }
  0x36   :  { %226 = vmatprep.subr.bf16.mxu0 %v340_v0 }
  0x39   :  { %227 = vmatpush3.bf16.msra.mxu0 %v247_v8 }
  0x3c   :  { %229 = vmatmul.mubr.bf16.vlgmr.msra.gmra.mxu0 %v42_v9 }
  0xfc   :  { %v141_v10 = vpop.f32.mrf.mxu0 }
  0xfd   :  { %v149_v11 = vrot.slane %v141_v10, 4  ;;  %v155_v12 = vmul.f32 %v141_v10, %v141_v10  ;;  %v147_v13 = vpack.c.bf16 %v141_v10, %v141_v10 }
  0xfe   :  { %v230_v14 = vpop.f32.mrf.mxu0 }
  0xff   :  { %v150_v15 = vadd.f32 %v149_v11, %v141_v10  ;;  %v156_v16 = vrot.slane %v155_v12, 4  ;;  %148 = vst [vmem:[#allocation7] sm:$0xf] %v147_v13 }
 0x100   :  { %v144_v17 = vpop.f32.mrf.mxu0 }
 0x101   :  { %299 = shalt.err (!%p296_p0)
}
 0x102   :  { %174 = dma.vmem_to_hbm [thread:$0]  %s172_s1, 64, %s378_s2, [#allocation4]   ;;  %v151_v18 = vrot.slane %v150_v15, 2  ;;  %v157_v19 = vadd.f32 %v156_v16, %v155_v12  ;;  %v231_v20 = vpop.f32.mrf.mxu0  ;;  %vm162_vm1 = vcmask 1040384  }
 0x103   :  { %s343_s27 = smov [#allocation8]  }
 0x104   :  { %v152_v21 = vadd.f32 %v151_v18, %v150_v15  ;;  %v158_v22 = vrot.slane %v157_v19, 2  ;;  %s181_s28 = sshll.u32 %s343_s27, 4  ;;  %s182_s28 = int_to_ptr.vmem [resolvable:$true] %s181_s28 }
 0x105   :  { %s308_s29 = scalar_lea.vmem %s182_s28, 32  ;;  %p313_p2 = scmp.lt.s32.totalorder %s182_s28, %s182_s28 }
 0x106   :  { %v153_v23 = vrot.slane %v152_v21, 1  ;;  %v159_v24 = vadd.f32 %v158_v22, %v157_v19  ;;  %p309_p1 = scmp.ne.s32.totalorder %s182_s28, %s308_s29  ;;  %p314_p3 = scmp.lt.s32.totalorder %s308_s29, %s308_s29 }
 0x108   :  { %v160_v25 = vrot.slane %v159_v24, 1  ;;  %v154_v26 = vadd.f32 %v153_v23, %v152_v21  ;;  %p315_p4 = por %p314_p3, %p313_p2 }
 0x10a   :  { %v161_v27 = vadd.f32 %v160_v25, %v159_v24  ;;  %p316_p5 = pnand %p315_p4, %p309_p1 }
 0x10c   :  { %v163_v28 = vsel %vm162_vm1, %v154_v26, %v161_v27 }
 0x10d   :  { %164 = vst [vmem:[#allocation8] sm:$0x3] %v163_v28 }
 0x10e   :  { %319 = shalt.err (!%p316_p5)
}
 0x10f   :  { %184 = dma.vmem_to_hbm [thread:$0]  %s182_s28, 32, %s379_s3, [#allocation9]  }
 0x110   :  { %332 = dma.done.wait [#allocation4], 64  }
 0x111   :  { %333 = vsyncadd [#allocation4], 4294967232 }
 0x112   :  { %334 = dma.done.wait [#allocation9], 32  }
 0x113   :  { %335 = vsyncadd [#allocation9], 4294967264 }
 0x114   :  { %191 = vsyncpa [#allocation3], 1 }
 0x115   :  { %192 = vsyncpa [#allocation6], 1 }
 0x116   :  { %193 = vsyncpa [#allocation4], 1 }
 0x117   :  { %194 = vsyncpa [#allocation9], 1 }

</bundles_post_ra>
